<compile_context>
chip_gen: v7x
topology: tpu7x:2x2x1
jax: 0.10.0
libtpu: 0.0.40
codegen_flags: <defaults>
</compile_context>

<pallas_src>
from functools import partial

import jax
import jax.numpy as jnp
from jax import lax
from jax.experimental import pallas as pl
from jax.experimental.pallas import tpu as pltpu


# ---------------------------------------------------------------------------
# Sizing helpers
# ---------------------------------------------------------------------------

def _vmem_capacity_bytes():
    try:
        return int(pltpu.get_tpu_info().vmem_capacity_bytes)
    except Exception:
        return 64 << 20  # conservative (v7x-sized) fallback


def _block_budget_bytes():
    # Total bytes allowed for resident blocks: in + out, double-buffered.
    cap = _vmem_capacity_bytes()
    return (16 << 20) if cap <= (64 << 20) else (32 << 20)


def _sublane_pack(dtype):
    itemsize = jnp.dtype(dtype).itemsize
    return max(8, 32 // itemsize)  # 8 for 32-bit, 16 for bf16/f16, 32 for int8/fp8


def _sanitize_tb(tb, T, dtype):
    pack = _sublane_pack(dtype)
    tb = int(tb)
    if tb >= T:
        return T                       # full block: always legal
    return max(pack, (tb // pack) * pack)


def _default_tb(T, F, dtype):
    pack = _sublane_pack(dtype)
    itemsize = jnp.dtype(dtype).itemsize
    block_bytes = _block_budget_bytes() // 4          # per (TB, F) block
    tb = max(pack, block_bytes // max(F * itemsize, 1))
    tb = (tb // pack) * pack
    return T if tb >= T else tb


def _vmem_limit_bytes(tb, F, dtype):
    need = 4 * tb * F * jnp.dtype(dtype).itemsize + (2 << 20)
    cap = _vmem_capacity_bytes()
    return int(min(max(need, 24 << 20), cap - (8 << 20)))


# ---------------------------------------------------------------------------
# Kernels
# ---------------------------------------------------------------------------

def _apply_mask_block(row0, scalars_ref, x_ref, o_ref):
    """Mask rows [t0, t_end) of this (TB, F) block; row0 = global first row."""
    tb = x_ref.shape[0]
    t0 = scalars_ref[0]
    t_end = scalars_ref[1]

    overlap = jnp.logical_and(row0 < t_end, row0 + tb > t0)

    @pl.when(jnp.logical_not(overlap))
    def _():
        # Fast path: no masked rows in this tile -> straight copy.
        o_ref[...] = x_ref[...]

    @pl.when(overlap)
    def _():
        # (TB, 1) column mask broadcast along the 128-wide lane axis.
        rows = row0 + lax.broadcasted_iota(jnp.int32, (tb, 1), 0)
        keep = jnp.logical_or(rows < t0, rows >= t_end)
        o_ref[...] = jnp.where(keep, x_ref[...], jnp.zeros((), o_ref.dtype))


def _time_mask_kernel(scalars_ref, x_ref, o_ref):
    # Dense grid over all time tiles (copy variant).
    row0 = pl.program_id(0) * x_ref.shape[0]
    _apply_mask_block(row0, scalars_ref, x_ref, o_ref)


def _time_mask_windowed_kernel(nblocks, scalars_ref, x_ref, o_ref):
    # Grid visits only tiles near [t0, t_end); recompute the clamped global
    # block index exactly as the index_map does.
    tb = x_ref.shape[0]
    blk = jnp.clip(scalars_ref[0] // tb + pl.program_id(0), 0, nblocks - 1)
    _apply_mask_block(blk * tb, scalars_ref, x_ref, o_ref)


# ---------------------------------------------------------------------------
# Wrappers
# ---------------------------------------------------------------------------

@partial(jax.jit, static_argnames=("tb",))
def time_mask_apply(x, scalars, tb=None):
    """Copy variant: zero rows [t0, t0+t) of x; scalars = int32[2] = [t0, t0+t]."""
    T, F = x.shape
    tb = _default_tb(T, F, x.dtype) if tb is None else _sanitize_tb(tb, T, x.dtype)
    grid = (pl.cdiv(T, tb),)
    return pl.pallas_call(
        _time_mask_kernel,
        out_shape=jax.ShapeDtypeStruct((T, F), x.dtype),
        grid_spec=pltpu.PrefetchScalarGridSpec(
            num_scalar_prefetch=1,
            grid=grid,
            in_specs=[pl.BlockSpec((tb, F), lambda i, s: (i, 0))],
            out_specs=pl.BlockSpec((tb, F), lambda i, s: (i, 0)),
        ),
        compiler_params=pltpu.CompilerParams(
            dimension_semantics=("parallel",),
            vmem_limit_bytes=_vmem_limit_bytes(tb, F, x.dtype)),
    )(scalars, x)


@partial(jax.jit, static_argnames=("tb", "p"), donate_argnums=(0,))
def time_mask_apply_inplace(x, scalars, tb=None, p=50):
    """In-place variant: x is DONATED; only tiles intersecting [t0, t0+t) are
    DMA'd (HBM traffic ~ 2*(p+TB)*F*itemsize instead of 2*T*F*itemsize)."""
    T, F = x.shape
    if tb is None:
        # Keep visited tiles close to the mask-window size (sublane-aligned).
        pack = _sublane_pack(x.dtype)
        tb = _sanitize_tb(max(pack, -(-min(p, T) // pack) * pack), T, x.dtype)
    else:
        tb = _sanitize_tb(tb, T, x.dtype)

    nblocks = pl.cdiv(T, tb)
    n_visit = min(pl.cdiv(p, tb) + 1, nblocks)

    def idx_map(i, s):
        return (jnp.clip(s[0] // tb + i, 0, nblocks - 1), 0)

    return pl.pallas_call(
        partial(_time_mask_windowed_kernel, nblocks),
        out_shape=jax.ShapeDtypeStruct((T, F), x.dtype),
        grid_spec=pltpu.PrefetchScalarGridSpec(
            num_scalar_prefetch=1,
            grid=(n_visit,),
            in_specs=[pl.BlockSpec((tb, F), idx_map)],
            out_specs=pl.BlockSpec((tb, F), idx_map),
        ),
        input_output_aliases={1: 0},
        compiler_params=pltpu.CompilerParams(
            dimension_semantics=("arbitrary",),
            vmem_limit_bytes=_vmem_limit_bytes(tb, F, x.dtype)),
    )(scalars, x)


def _draw_mask_params(key, time, p):
    """Device-resident draws of [t0, t0+t]; mirrors the torch .random_ logic."""
    k1, k2 = jax.random.split(key)
    t = jax.random.randint(k1, (), 0, p, dtype=jnp.int32)
    to_sample = jnp.maximum(jnp.int32(time) - t, 1)
    t0 = jax.random.randint(k2, (), 0, to_sample, dtype=jnp.int32)
    return jnp.stack([t0, t0 + t]).astype(jnp.int32)


class TimeMask:
    """JAX/Pallas port of the PyTorch TimeMask module (training-mode forward)."""

    def __init__(self, n=1, p=50, tb=None, inplace=False):
        self.p = p
        self.n = 1              # reference module forces n = 1
        self.tb = tb
        self.inplace = inplace  # if True, inputs are donated per call
        self.training = True

    def __call__(self, x, key):
        if not self.training:
            return x
        for _ in range(self.n):
            key, sub = jax.random.split(key)
            scalars = _draw_mask_params(sub, x.shape[0], self.p)
            if self.inplace:
                x = time_mask_apply_inplace(x, scalars, tb=self.tb, p=self.p)
            else:
                x = time_mask_apply(x, scalars, tb=self.tb)
        return x


if __name__ == "__main__":
    key = jax.random.PRNGKey(0)
    kx, kmask = jax.random.split(key)

    T, F = 64, 128                      # (time, freq)
    x = jax.random.normal(kx, (T, F), dtype=jnp.float32)

    tm = TimeMask(n=1, p=50)
    y = jax.block_until_ready(tm(x, kmask))

    # Pure-JAX reference using the exact same key path / device-side draws.
    _, sub = jax.random.split(kmask)
    k1, k2 = jax.random.split(sub)
    t = jax.random.randint(k1, (), 0, tm.p, dtype=jnp.int32)
    t0 = jax.random.randint(k2, (), 0, jnp.maximum(jnp.int32(T) - t, 1),
                            dtype=jnp.int32)
    rows = jnp.arange(T)[:, None]
    ref = jnp.where((rows >= t0) & (rows < t0 + t), 0.0, x)

    assert y.shape == x.shape and y.dtype == x.dtype
    assert jnp.allclose(y, ref), "mismatch vs reference (copy, default tb)"

    scalars = jnp.stack([t0, t0 + t]).astype(jnp.int32)

    # Multi-tile copy path (exercises fast-path + overlap branches).
    y2 = jax.block_until_ready(time_mask_apply(x, scalars, tb=8))
    assert jnp.allclose(y2, ref), "mismatch vs reference (copy, tb=8)"

    # In-place aliased window-only variant (input is donated -> pass a copy).
    y3 = jax.block_until_ready(time_mask_apply_inplace(x + 0.0, scalars, p=50))
    assert jnp.allclose(y3, ref), "mismatch vs reference (inplace, default tb)"

    y4 = jax.block_until_ready(
        time_mask_apply_inplace(x + 0.0, scalars, tb=8, p=50))
    assert jnp.allclose(y4, ref), "mismatch vs reference (inplace, tb=8)"

    # t = 0 edge case (empty mask window) on both variants.
    s0 = jnp.array([3, 3], jnp.int32)
    assert jnp.allclose(jax.block_until_ready(time_mask_apply(x, s0)), x)
    assert jnp.allclose(
        jax.block_until_ready(time_mask_apply_inplace(x + 0.0, s0, p=50)), x)

    print("KERNEL_OK")
</pallas_src>

<mosaic_0001>
module attributes {stable_mosaic.version = 11 : i64} {
  func.func @_time_mask_kernel(%arg0: i32, %arg1: memref<2xi32, #tpu.memory_space<smem>>, %arg2: memref<64x128xf32, #tpu.memory_space<vmem>>, %arg3: memref<64x128xf32, #tpu.memory_space<vmem>>) attributes {dimension_semantics = [#tpu.dimension_semantics<parallel>], iteration_bounds = array<i64: 1>, scalar_prefetch = 1 : i64, scratch_operands = 0 : i64, tpu.core_type = #tpu.core_type<tc>, window_params = [{transform_indices = @transform_0, window_bounds = array<i64: 64, 128>}, {transform_indices = @transform_1, window_bounds = array<i64: 64, 128>}]} {
    %c64_i32 = arith.constant 64 : i32
    %0 = arith.muli %arg0, %c64_i32 : i32
    %c0 = arith.constant 0 : index
    %1 = memref.load %arg1[%c0] : memref<2xi32, #tpu.memory_space<smem>>
    %c1 = arith.constant 1 : index
    %2 = memref.load %arg1[%c1] : memref<2xi32, #tpu.memory_space<smem>>
    %3 = arith.cmpi slt, %0, %2 : i32
    %c64_i32_0 = arith.constant 64 : i32
    %4 = arith.addi %0, %c64_i32_0 : i32
    %5 = arith.cmpi sgt, %4, %1 : i32
    %6 = arith.andi %3, %5 : i1
    %true = arith.constant true
    %7 = arith.xori %6, %true : i1
    %8 = arith.extui %7 : i1 to i32
    %c0_i32 = arith.constant 0 : i32
    %9 = arith.cmpi ne, %8, %c0_i32 : i32
    scf.if %9 {
      %c0_2 = arith.constant 0 : index
      %c0_3 = arith.constant 0 : index
      %12 = vector.load %arg2[%c0_2, %c0_3] : memref<64x128xf32, #tpu.memory_space<vmem>>, vector<64x128xf32>
      %c0_4 = arith.constant 0 : index
      %c0_5 = arith.constant 0 : index
      %13 = vector.load %arg3[%c0_4, %c0_5] : memref<64x128xf32, #tpu.memory_space<vmem>>, vector<64x128xf32>
      tpu.vector_store %arg3[%c0_4, %c0_5], %12 {strides = array<i32>} : memref<64x128xf32, #tpu.memory_space<vmem>>, vector<64x128xf32>,
    } else {
    }
    %10 = arith.extui %6 : i1 to i32
    %c0_i32_1 = arith.constant 0 : i32
    %11 = arith.cmpi ne, %10, %c0_i32_1 : i32
    scf.if %11 {
      %12 = tpu.iota {dimensions = array<i32: 0>} : vector<64x1xi32>
      %13 = vector.broadcast %0 : i32 to vector<64x1xi32>
      %14 = arith.addi %13, %12 : vector<64x1xi32>
      %15 = vector.broadcast %1 : i32 to vector<64x1xi32>
      %16 = arith.cmpi slt, %14, %15 : vector<64x1xi32>
      %17 = vector.broadcast %2 : i32 to vector<64x1xi32>
      %18 = arith.cmpi sge, %14, %17 : vector<64x1xi32>
      %19 = arith.ori %16, %18 : vector<64x1xi1>
      %c0_2 = arith.constant 0 : index
      %c0_3 = arith.constant 0 : index
      %20 = vector.load %arg2[%c0_2, %c0_3] : memref<64x128xf32, #tpu.memory_space<vmem>>, vector<64x128xf32>
      %cst = arith.constant 0.000000e+00 : f32
      %21 = vector.shape_cast %19 : vector<64x1xi1> to vector<64x1xi1>
      %22 = vector.broadcast %21 : vector<64x1xi1> to vector<64x128xi1>
      %23 = vector.broadcast %cst : f32 to vector<64x128xf32>
      %24 = arith.select %22, %20, %23 : vector<64x128xi1>, vector<64x128xf32>
      %c0_4 = arith.constant 0 : index
      %c0_5 = arith.constant 0 : index
      %25 = vector.load %arg3[%c0_4, %c0_5] : memref<64x128xf32, #tpu.memory_space<vmem>>, vector<64x128xf32>
      tpu.vector_store %arg3[%c0_4, %c0_5], %24 {strides = array<i32>} : memref<64x128xf32, #tpu.memory_space<vmem>>, vector<64x128xf32>,
    } else {
    }
    return
  }
  func.func @transform_0(%arg0: i32, %arg1: memref<2xi32, #tpu.memory_space<smem>>) -> (i32, i32) {
    %c0_i32 = arith.constant 0 : i32
    %c0_i32_0 = arith.constant 0 : i32
    return %arg0, %c0_i32 : i32, i32
  }
  func.func @transform_1(%arg0: i32, %arg1: memref<2xi32, #tpu.memory_space<smem>>) -> (i32, i32) {
    %c0_i32 = arith.constant 0 : i32
    %c0_i32_0 = arith.constant 0 : i32
    return %arg0, %c0_i32 : i32, i32
  }
}

</mosaic_0001>

<bundles_post_ra>
// kernel: time_mask_apply.1
= control target key start
LH: loop header
LB: loop body
LE: loop exit
PB: predicated region body
PF: predicated region fallthrough
CT: control target
= control target key end

     0   :  { %s294_s0 = inlined_call_operand.vmem [shape: s32[2], index: 0, kind: input, shape index: {}]   ;;  %s295_s1 = inlined_call_operand.hbm [shape: f32[64,128], index: 1, kind: input, shape index: {}]   ;;  %s296_s2 = inlined_call_operand.hbm [shape: f32[64,128], index: 2, kind: output, shape index: {}]  }
   0x1   :  { %s7_s11 = sshll.u32 %s294_s0, 4  ;;  %s8_s11 = int_to_ptr.vmem [resolvable:$true] %s7_s11 }
   0x2   :  { %s168_s12 = scalar_lea.vmem %s8_s11, 16  ;;  %p173_p1 = scmp.lt.s32.totalorder %s8_s11, %s8_s11 }
   0x3   :  { %p169_p0 = scmp.ne.s32.totalorder %s8_s11, %s168_s12  ;;  %p174_p2 = scmp.lt.s32.totalorder %s168_s12, %s168_s12 }
   0x5   :  { %p175_p3 = por %p174_p2, %p173_p1 }
   0x7   :  { %p176_p4 = pnand %p175_p3, %p169_p0 }
   0x9   :  { %179 = shalt.err (!%p176_p4)  }
   0xa   :  { %s230_s13 = smov [#allocation3]  }
   0xb   :  { %10 = dma.vmem_to_smem %s8_s11, 16, %s230_s13, [#allocation2] }
   0xc   :  { %224 = dma.done.wait [#allocation2], 16 }
   0xd   :  { %225 = vsyncadd [#allocation2], 4294967280 }
   0xe   :  { %12 = sfence }
   0xf   :  { %13 = vsyncpa [#allocation5], 0 }
  0x10   :  { %14 = vsyncpa [#allocation6], 0  ;;  %s231_s14 = smov [#allocation4]   ;;  %s180_s17 = scalar_lea.hbm %s295_s1, 1024 }
  0x11   :  { %s20_s15 = sshll.u32 %s231_s14, 4  ;;  %p181_p5 = scmp.ne.s32.totalorder %s295_s1, %s180_s17  ;;  %s21_s15 = int_to_ptr.vmem [resolvable:$true] %s20_s15 }
  0x12   :  { %p184_p6 = scmp.lt.u32.totalorder %s180_s17, %s295_s1 }
  0x14   :  { %p186_p7 = pnand %p184_p6, %p181_p5 }
  0x16   :  { %189 = shalt.err (!%p186_p7)
}
  0x17   :  { %s190_s22 = scalar_lea.vmem %s21_s15, 1024  ;;  %p195_p9 = scmp.lt.s32.totalorder %s21_s15, %s21_s15 }
  0x18   :  { %p191_p8 = scmp.ne.s32.totalorder %s21_s15, %s190_s22  ;;  %p196_p10 = scmp.lt.s32.totalorder %s190_s22, %s190_s22 }
  0x1a   :  { %p197_p11 = por %p196_p10, %p195_p9 }
  0x1c   :  { %p198_p12 = pnand %p197_p11, %p191_p8 }
  0x1e   :  { %201 = shalt.err (!%p198_p12)
}
  0x1f   :  { %s232_s23 = smov 128   ;;  %s233_s24 = smov 8  }
  0x20   :  { %26 = dma.hbm_to_vmem [thread:$0]  %s295_s1, 1024, %s21_s15, [#allocation5], %s232_s23, %s232_s23, %s233_s24  }
  0x21   :  { %226 = dma.done.wait [#allocation5], 1024  }
  0x22   :  { %227 = vsyncadd [#allocation5], 4294966272  ;;  %s31_s27 = sld [smem:[#allocation3]]  ;;  %s160_s28 = sld [smem:[#allocation3 + $0x1]] }
  0x28   :  { %p161_p13 = scmp.gt.s32.totalorder %s160_s28, 0  ;;  %p162_p0 = scmp.lt.s32.totalorder %s31_s27, 64 }
  0x2a   :  { %p268_p1 = pnand %p162_p0, %p161_p13 }
  0x2b   :  { %v40_v0 = vlaneseq (!%p268_p1)  ;;  %v58_v1 = vstv (!%p268_p1), %s31_s27  ;;  %v67_v2 = vstv (!%p268_p1), %s160_s28  ;;  %v84_v4 = vld [vmem:[#allocation4] sm:$0xff] (!%p268_p1)  ;;  %v85_v7 = vld [vmem:[#allocation4 + $0x8] sm:$0xff] (!%p268_p1)  ;;  %v86_v13 = vld [vmem:[#allocation4 + $0x10] sm:$0xff] (!%p268_p1) }
  0x2c   :  { %39 = sbr.rel (%p268_p1) target bundleno = 59 (0x3b), region = 13  ;;  %v87_v14 = vld [vmem:[#allocation4 + $0x18] sm:$0xff] (!%p268_p1)  ;;  %v88_v16 = vld [vmem:[#allocation4 + $0x20] sm:$0xff] (!%p268_p1)  ;;  %v89_v18 = vld [vmem:[#allocation4 + $0x28] sm:$0xff] (!%p268_p1) }
  0x2d   :  { %v41_v3 = vshrl.u32 (!%p268_p1), %v40_v0, 7  ;;  %v90_v21 = vld [vmem:[#allocation4 + $0x30] sm:$0xff] (!%p268_p1)  ;;  %v91_v23 = vld [vmem:[#allocation4 + $0x38] sm:$0xff] (!%p268_p1) }
  0x2f   :  { %vm59_vm0 = vcmp.lt.s32.totalorder (!%p268_p1), %v41_v3, %v58_v1  ;;  %vm68_vm1 = vcmp.ge.s32.totalorder (!%p268_p1), %v41_v3, %v67_v2  ;;  %v42_v5 = vadd.s32 (!%p268_p1), 8, %v41_v3  ;;  %v43_v6 = vadd.s32 (!%p268_p1), 16, %v41_v3 }
  0x30   :  { %vm76_vm2 = vmor (!%p268_p1), %vm59_vm0, %vm68_vm1  ;;  %v44_v8 = vadd.s32 (!%p268_p1), 24, %v41_v3  ;;  %v45_v9 = vadd.s32 (!%p268_p1), 32, %v41_v3  ;;  %v46_v10 = vadd.s32 (!%p268_p1), 40, %v41_v3  ;;  %v47_v11 = vadd.s32 (!%p268_p1), 48, %v41_v3 }
  0x31   :  { %v108_v12 = vsel (!%p268_p1), %vm76_vm2, %v84_v4, 0.0  ;;  %vm60_vm3 = vcmp.lt.s32.totalorder (!%p268_p1), %v42_v5, %v58_v1  ;;  %vm69_vm4 = vcmp.ge.s32.totalorder (!%p268_p1), %v42_v5, %v67_v2  ;;  %vm61_vm5 = vcmp.lt.s32.totalorder (!%p268_p1), %v43_v6, %v58_v1 }
  0x32   :  { %116 = vst [vmem:[#allocation7] sm:$0xff] (!%p268_p1), %v108_v12  ;;  %vm77_vm6 = vmor (!%p268_p1), %vm60_vm3, %vm69_vm4  ;;  %vm70_vm7 = vcmp.ge.s32.totalorder (!%p268_p1), %v43_v6, %v67_v2  ;;  %vm62_vm8 = vcmp.lt.s32.totalorder (!%p268_p1), %v44_v8, %v58_v1  ;;  %vm71_vm9 = vcmp.ge.s32.totalorder (!%p268_p1), %v44_v8, %v67_v2  ;;  %vm63_vm10 = vcmp.lt.s32.totalorder (!%p268_p1), %v45_v9, %v58_v1 }
  0x33   :  { %v109_v15 = vsel %vm77_vm6, %v85_v7, 0.0  ;;  %vm78_vm11 = vmor %vm61_vm5, %vm70_vm7  ;;  %vm72_vm12 = vcmp.ge.s32.totalorder %v45_v9, %v67_v2  ;;  %vm64_vm13 = vcmp.lt.s32.totalorder %v46_v10, %v58_v1  ;;  %vm73_vm14 = vcmp.ge.s32.totalorder %v46_v10, %v67_v2 }
  0x34   :  { %117 = vst [vmem:[#allocation7 + $0x8] sm:$0xff] %v109_v15  ;;  %v110_v17 = vsel %vm78_vm11, %v86_v13, 0.0  ;;  %vm79_vm15 = vmor %vm62_vm8, %vm71_vm9  ;;  %vm65_vm0 = vcmp.lt.s32.totalorder %v47_v11, %v58_v1  ;;  %vm74_vm1 = vcmp.ge.s32.totalorder %v47_v11, %v67_v2  ;;  %v48_v19 = vadd.s32 56, %v41_v3 }
  0x35   :  { %118 = vst [vmem:[#allocation7 + $0x10] sm:$0xff] %v110_v17  ;;  %v111_v20 = vsel %vm79_vm15, %v87_v14, 0.0  ;;  %vm80_vm2 = vmor %vm63_vm10, %vm72_vm12 }
  0x36   :  { %119 = vst [vmem:[#allocation7 + $0x18] sm:$0xff] %v111_v20  ;;  %v112_v22 = vsel %vm80_vm2, %v88_v16, 0.0  ;;  %vm81_vm3 = vmor %vm64_vm13, %vm73_vm14  ;;  %vm66_vm4 = vcmp.lt.s32.totalorder %v48_v19, %v58_v1  ;;  %vm75_vm5 = vcmp.ge.s32.totalorder %v48_v19, %v67_v2 }
  0x37   :  { %120 = vst [vmem:[#allocation7 + $0x20] sm:$0xff] %v112_v22  ;;  %v113_v24 = vsel %vm81_vm3, %v89_v18, 0.0  ;;  %vm82_vm6 = vmor %vm65_vm0, %vm74_vm1 }
  0x38   :  { %121 = vst [vmem:[#allocation7 + $0x28] sm:$0xff] %v113_v24  ;;  %v114_v25 = vsel %vm82_vm6, %v90_v21, 0.0  ;;  %vm83_vm7 = vmor %vm66_vm4, %vm75_vm5 }
  0x39   :  { %122 = vst [vmem:[#allocation7 + $0x30] sm:$0xff] %v114_v25  ;;  %v115_v26 = vsel %vm83_vm7, %v91_v23, 0.0 }
  0x3a   :  { %123 = vst [vmem:[#allocation7 + $0x38] sm:$0xff] %v115_v26 }
  0x3b PF:  { %126 = sbr.rel (!%p268_p1) target bundleno = 66 (0x42), region = 17  ;;  %v127_v27 = vld [vmem:[#allocation4] sm:$0xff] (%p268_p1)  ;;  %v128_v28 = vld [vmem:[#allocation4 + $0x8] sm:$0xff] (%p268_p1)  ;;  %v129_v29 = vld [vmem:[#allocation4 + $0x10] sm:$0xff] (%p268_p1) }
  0x3c   :  { %135 = vst [vmem:[#allocation7] sm:$0xff] (%p268_p1), %v127_v27  ;;  %136 = vst [vmem:[#allocation7 + $0x8] sm:$0xff] (%p268_p1), %v128_v28  ;;  %v130_v30 = vld [vmem:[#allocation4 + $0x18] sm:$0xff] (%p268_p1)  ;;  %v131_v31 = vld [vmem:[#allocation4 + $0x20] sm:$0xff] (%p268_p1) }
  0x3d   :  { %137 = vst [vmem:[#allocation7 + $0x10] sm:$0xff] (%p268_p1), %v129_v29  ;;  %v132_v32 = vld [vmem:[#allocation4 + $0x28] sm:$0xff] (%p268_p1)  ;;  %138 = vst [vmem:[#allocation7 + $0x18] sm:$0xff] (%p268_p1), %v130_v30  ;;  %v133_v33 = vld [vmem:[#allocation4 + $0x30] sm:$0xff] (%p268_p1) }
  0x3e   :  { %139 = vst [vmem:[#allocation7 + $0x20] sm:$0xff] (%p268_p1), %v131_v31  ;;  %140 = vst [vmem:[#allocation7 + $0x28] sm:$0xff] (%p268_p1), %v132_v32  ;;  %v134_v34 = vld [vmem:[#allocation4 + $0x38] sm:$0xff] (%p268_p1) }
  0x3f   :  { %141 = vst [vmem:[#allocation7 + $0x30] sm:$0xff] (%p268_p1), %v133_v33  ;;  %142 = vst [vmem:[#allocation7 + $0x38] sm:$0xff] (%p268_p1), %v134_v34 }
  0x42 PF:  { %s234_s1 = smov [#allocation7]  }
  0x43   :  { %s148_s30 = sshll.u32 %s234_s1, 4  ;;  %s149_s30 = int_to_ptr.vmem [resolvable:$true] %s148_s30 }
  0x44   :  { %s202_s3 = scalar_lea.vmem %s149_s30, 1024  ;;  %p207_p3 = scmp.lt.s32.totalorder %s149_s30, %s149_s30 }
  0x45   :  { %p203_p2 = scmp.ne.s32.totalorder %s149_s30, %s202_s3  ;;  %p208_p4 = scmp.lt.s32.totalorder %s202_s3, %s202_s3 }
  0x47   :  { %p209_p5 = por %p208_p4, %p207_p3 }
  0x49   :  { %p210_p6 = pnand %p209_p5, %p203_p2 }
  0x4b   :  { %213 = shalt.err (!%p210_p6)
}
  0x4c   :  { %s214_s6 = scalar_lea.hbm %s296_s2, 1024 }
  0x4d   :  { %p215_p7 = scmp.ne.s32.totalorder %s296_s2, %s214_s6  ;;  %p218_p8 = scmp.lt.u32.totalorder %s214_s6, %s296_s2 }
  0x4f   :  { %p220_p9 = pnand %p218_p8, %p215_p7 }
  0x51   :  { %223 = shalt.err (!%p220_p9)
}
  0x52   :  { %154 = dma.vmem_to_hbm [thread:$0]  %s149_s30, 1024, %s296_s2, [#allocation6], %s232_s23, %s232_s23, %s233_s24  }
  0x53   :  { %228 = dma.done.wait [#allocation6], 1024  }
  0x54   :  { %229 = vsyncadd [#allocation6], 4294966272 }
  0x55   :  { %158 = vsyncpa [#allocation5], 1 }
  0x56   :  { %159 = vsyncpa [#allocation6], 1 }

</bundles_post_ra>
